<compile_context>
chip_gen: v6e
topology: v6e:2x2x1
jax: 0.10.0
libtpu: 0.0.40
codegen_flags: <defaults>
</compile_context>

<pallas_src>
import math
import functools

import jax
import jax.numpy as jnp
from jax import lax
from jax.experimental import pallas as pl
from jax.experimental.pallas import tpu as pltpu

_VMEM_LIMIT = 48 * 1024 * 1024  # leaves headroom under v7x's 64 MiB physical VMEM


# ----------------------------------------------------------------------------
# Tile-size helpers
# ----------------------------------------------------------------------------
def _round_up(x, m):
    return ((x + m - 1) // m) * m


def _largest_divisor_tile(n, cap):
    """Largest tile <= cap that divides n and is a multiple of 8 (else n itself)."""
    if n <= cap:
        return n
    cap = (cap // 8) * 8
    for t in range(cap, 7, -8):
        if n % t == 0:
            return t
    return n


def _pick_row_tile(m):
    """Row tile for the matmul kernels (multiple of 8; m gets padded up to a multiple of it).
    Keeps >=2 grid steps when m allows so both v7x TensorCores get work."""
    cap = 512 if m >= 1024 else 256
    if m <= cap:
        return _round_up(m, 8)
    t = _largest_divisor_tile(m, cap)
    return t if t <= cap else cap  # no nice divisor -> pad m up to a multiple of `cap`


# ----------------------------------------------------------------------------
# Linear (projection) kernels: y = x @ W (+ b), bf16 MXU operands, f32 accumulate
# ----------------------------------------------------------------------------
def _linear_bias_kernel(x_ref, w_ref, b_ref, o_ref):
    acc = jnp.dot(x_ref[...].astype(jnp.bfloat16), w_ref[...].astype(jnp.bfloat16),
                  preferred_element_type=jnp.float32)
    o_ref[...] = (acc + b_ref[...].astype(jnp.float32)).astype(o_ref.dtype)


def _linear_kernel(x_ref, w_ref, o_ref):
    o_ref[...] = jnp.dot(x_ref[...].astype(jnp.bfloat16), w_ref[...].astype(jnp.bfloat16),
                         preferred_element_type=jnp.float32).astype(o_ref.dtype)


def pallas_linear(x2d, w, b=None):
    """y = x2d @ w (+ b); x2d: (M, K), w: (K, N), b: (N,) or None (bias add skipped)."""
    M, K = x2d.shape
    Kw, N = w.shape
    assert K == Kw
    tile_m = _pick_row_tile(M)
    Mp = _round_up(M, tile_m)
    if Mp != M:
        x2d = jnp.pad(x2d, ((0, Mp - M), (0, 0)))

    in_specs = [pl.BlockSpec((tile_m, K), lambda i: (i, 0)),
                pl.BlockSpec((K, N), lambda i: (0, 0))]
    args = [x2d, w]
    kernel = _linear_kernel
    if b is not None:
        in_specs.append(pl.BlockSpec((1, N), lambda i: (0, 0)))
        args.append(b.reshape(1, N))
        kernel = _linear_bias_kernel

    out = pl.pallas_call(
        kernel,
        out_shape=jax.ShapeDtypeStruct((Mp, N), x2d.dtype),
        grid=(Mp // tile_m,),
        in_specs=in_specs,
        out_specs=pl.BlockSpec((tile_m, N), lambda i: (i, 0)),
        compiler_params=pltpu.CompilerParams(
            dimension_semantics=("parallel",),
            vmem_limit_bytes=_VMEM_LIMIT),
    )(*args)
    return out[:M] if Mp != M else out


# ----------------------------------------------------------------------------
# Tri-plane attention kernel: 1 query token vs its private F keys, all heads per block,
# lane-dense (tokens, heads*dim_head) output.  k == v (as in the PyTorch module).
# ----------------------------------------------------------------------------
def _triplane_attn_kernel(q_ref, kv_ref, o_ref, *, heads, dim_head, scale):
    q = q_ref[...]          # (TN, H*Dh) f32
    kv = kv_ref[...]        # (TN, F, H*Dh) f32
    heads_out = []
    for h in range(heads):  # static unroll over heads; static lane slices
        sl = slice(h * dim_head, (h + 1) * dim_head)
        qh = q[:, sl]                                            # (TN, Dh)
        kvh = kv[:, :, sl]                                       # (TN, F, Dh)
        s = jnp.sum(qh[:, None, :] * kvh, axis=-1) * scale       # (TN, F)
        m = jnp.max(s, axis=-1, keepdims=True)
        p = jnp.exp(s - m)
        p = p * pl.reciprocal(jnp.sum(p, axis=-1, keepdims=True), approx=True)
        heads_out.append(jnp.sum(p[:, :, None] * kvh, axis=1))   # (TN, Dh)
    # single lane-dense store of the full (TN, heads*dim_head) tile
    o_ref[...] = jnp.concatenate(heads_out, axis=-1).astype(o_ref.dtype)


def pallas_triplane_attention(q, kv, *, heads, dim_head):
    """q: (N, inner); kv: (N, F, inner) with inner = heads*dim_head. Returns (N, inner)."""
    N, inner = q.shape
    _, F, _ = kv.shape
    # size the token tile from a ~4 MiB kv-block budget (double-buffered by the pipeline)
    per_tok_bytes = (F + 2) * inner * 4
    cap = max(8, min(1024, ((4 * 1024 * 1024) // per_tok_bytes) // 8 * 8))
    tile_n = _largest_divisor_tile(N, cap)
    scale = 1.0 / math.sqrt(dim_head)
    kernel = functools.partial(_triplane_attn_kernel,
                               heads=heads, dim_head=dim_head, scale=scale)
    return pl.pallas_call(
        kernel,
        out_shape=jax.ShapeDtypeStruct((N, inner), q.dtype),
        grid=(N // tile_n,),
        in_specs=[pl.BlockSpec((tile_n, inner), lambda i: (i, 0)),
                  pl.BlockSpec((tile_n, F, inner), lambda i: (i, 0, 0))],
        out_specs=pl.BlockSpec((tile_n, inner), lambda i: (i, 0)),
        compiler_params=pltpu.CompilerParams(
            dimension_semantics=("parallel",),
            vmem_limit_bytes=_VMEM_LIMIT),
    )(q, kv)


# ----------------------------------------------------------------------------
# Cross-attention (context != None): flash-style online softmax, tiled over Lk,
# all (batch*head) slices batched per grid step.
# ----------------------------------------------------------------------------
def _flash_attn_kernel(q_ref, k_ref, v_ref, o_ref, m_sc, l_sc, acc_sc, *, scale):
    ki = pl.program_id(1)

    @pl.when(ki == 0)
    def _():
        m_sc[...] = jnp.full_like(m_sc, -jnp.inf)
        l_sc[...] = jnp.zeros_like(l_sc)
        acc_sc[...] = jnp.zeros_like(acc_sc)

    q = q_ref[...].astype(jnp.bfloat16)          # (BH, tq, Dh)
    k = k_ref[...].astype(jnp.bfloat16)          # (BH, tk, Dh)
    s = jnp.einsum('bqd,bkd->bqk', q, k,
                   preferred_element_type=jnp.float32) * scale     # (BH, tq, tk) f32
    m_prev = m_sc[...]
    m_new = jnp.maximum(m_prev, jnp.max(s, axis=-1, keepdims=True))
    alpha = jnp.exp(m_prev - m_new)
    p = jnp.exp(s - m_new)
    l_sc[...] = alpha * l_sc[...] + jnp.sum(p, axis=-1, keepdims=True)
    acc_sc[...] = alpha * acc_sc[...] + jnp.einsum(
        'bqk,bkd->bqd', p.astype(jnp.bfloat16), v_ref[...].astype(jnp.bfloat16),
        preferred_element_type=jnp.float32)
    m_sc[...] = m_new

    @pl.when(ki == pl.num_programs(1) - 1)
    def _():
        o_ref[...] = (acc_sc[...] *
                      pl.reciprocal(l_sc[...], approx=True)).astype(o_ref.dtype)


def pallas_cross_attention(q, k, v):
    """q: (BH, Lq, Dh); k, v: (BH, Lk, Dh). Per-(batch*head) softmax attention."""
    BH, Lq, Dh = q.shape
    Lk = k.shape[1]
    scale = 1.0 / math.sqrt(Dh)
    tq = _largest_divisor_tile(Lq, 128 if Lq <= 1024 else 512)
    tk = _largest_divisor_tile(Lk, 512)
    kernel = functools.partial(_flash_attn_kernel, scale=scale)
    return pl.pallas_call(
        kernel,
        out_shape=jax.ShapeDtypeStruct((BH, Lq, Dh), q.dtype),
        grid=(Lq // tq, Lk // tk),
        in_specs=[pl.BlockSpec((BH, tq, Dh), lambda qi, ki: (0, qi, 0)),
                  pl.BlockSpec((BH, tk, Dh), lambda qi, ki: (0, ki, 0)),
                  pl.BlockSpec((BH, tk, Dh), lambda qi, ki: (0, ki, 0))],
        out_specs=pl.BlockSpec((BH, tq, Dh), lambda qi, ki: (0, qi, 0)),
        scratch_shapes=[pltpu.VMEM((BH, tq, 1), jnp.float32),
                        pltpu.VMEM((BH, tq, 1), jnp.float32),
                        pltpu.VMEM((BH, tq, Dh), jnp.float32)],
        compiler_params=pltpu.CompilerParams(
            dimension_semantics=("parallel", "arbitrary"),
            vmem_limit_bytes=_VMEM_LIMIT),
    )(q, k, v)


# ----------------------------------------------------------------------------
# Tri-plane key/value construction (pure gather/reshape glue -> plain JAX).
# Matches the PyTorch source verbatim, including `int(h/2 - 1)` as the replicated
# middle row/column and feat3 appearing in BOTH terms of p2_3 (as written in the spec).
# ----------------------------------------------------------------------------
def build_triplane_kv(q_proj):
    """q_proj: (3*b, l, d) projected queries of the 3 planes stacked along batch.
    Returns (q_all: (3b, l, d), kv_all: (3b, l, 4*sqrt(l), d)) in plane-major batch order."""
    tb, l, d = q_proj.shape
    b = tb // 3
    hh = int(math.isqrt(l))
    ww = hh
    planes = q_proj.reshape(b, 3, l, d)
    plane1, plane2, plane3 = planes[:, 0], planes[:, 1], planes[:, 2]
    feat1 = plane1.reshape(b, hh, ww, d)
    feat2 = plane2.reshape(b, hh, ww, d)
    feat3 = plane3.reshape(b, hh, ww, d)

    # i = xx.reshape(h*w), j = yy.reshape(h*w) from torch.meshgrid(arange(w), arange(h))
    i_idx = jnp.arange(l) % hh
    j_idx = jnp.arange(l) // hh
    mid = int(hh / 2 - 1)

    def rep_row(feat):   # middle row replicated for every query: (b, w, l, d)
        return jnp.broadcast_to(feat[:, mid, :, :][:, :, None, :], (b, ww, l, d))

    def rep_col(feat):   # middle column replicated for every query: (b, l, h, d)
        col = jnp.broadcast_to(feat[:, :, mid, :][:, :, None, :], (b, hh, l, d))
        return jnp.transpose(col, (0, 2, 1, 3))

    # keys for plane-1 queries
    p2_1 = jnp.transpose(
        jnp.concatenate([feat2[:, :, i_idx, :], rep_row(feat2)], axis=1), (0, 2, 1, 3))
    p3_1 = jnp.concatenate([rep_col(feat3), feat3[:, j_idx, :, :]], axis=2)
    # keys for plane-2 queries
    p1_2 = jnp.transpose(
        jnp.concatenate([feat1[:, :, i_idx, :], rep_row(feat1)], axis=1), (0, 2, 1, 3))
    p3_2 = jnp.transpose(
        jnp.concatenate([feat3[:, :, ww - 1 - j_idx, :], rep_row(feat3)], axis=1), (0, 2, 1, 3))
    # keys for plane-3 queries (feat3 in both terms of p2_3, exactly as in the PyTorch source)
    p1_3 = jnp.concatenate([rep_col(feat1), feat1[:, j_idx, :, :]], axis=2)
    p2_3 = jnp.concatenate([rep_col(feat3), feat3[:, hh - 1 - i_idx, :, :]], axis=2)

    p1_23 = jnp.concatenate([p2_1, p3_1], axis=2)
    p2_13 = jnp.concatenate([p1_2, p3_2], axis=2)
    p3_12 = jnp.concatenate([p1_3, p2_3], axis=2)

    q_all = jnp.concatenate([plane1, plane2, plane3], axis=0)       # (3b, l, d)
    kv_all = jnp.concatenate([p1_23, p2_13, p3_12], axis=0)         # (3b, l, 4h, d)
    return q_all, kv_all


# ----------------------------------------------------------------------------
# Module: parameter init + forward
# ----------------------------------------------------------------------------
def init_params(key, query_dim, context_dim, heads, dim_head):
    inner = heads * dim_head
    k1, k2, k3, k4, k5 = jax.random.split(key, 5)

    def lin(k, fan_in, fan_out):
        bound = 1.0 / math.sqrt(fan_in)
        return jax.random.uniform(k, (fan_in, fan_out), jnp.float32, -bound, bound)

    return dict(
        wq=lin(k1, query_dim, inner),      # to_q (bias=False)
        wk=lin(k2, context_dim, inner),    # to_k (bias=False)
        wv=lin(k3, context_dim, inner),    # to_v (bias=False)
        wo=lin(k4, inner, query_dim),      # to_out[0]
        bo=jax.random.uniform(k5, (query_dim,), jnp.float32,
                              -1.0 / math.sqrt(inner), 1.0 / math.sqrt(inner)),
    )


def mem_eff_cross_attention_tri(params, x, context=None, *, heads, dim_head):
    """Forward pass of MemoryEfficientCrossAttention_tri (dropout p=0.0 -> identity)."""
    inner = heads * dim_head
    B, L, Cq = x.shape

    # to_q (bias-free: no zero-bias DMA/add)
    q = pallas_linear(x.reshape(B * L, Cq), params["wq"]).reshape(B, L, inner)

    if context is None:
        # tri-plane self-attention path (x is (3*b, l, C))
        q_all, kv_all = build_triplane_kv(q)                 # (3b,l,inner), (3b,l,F,inner)
        tb, l, F, _ = kv_all.shape
        N = tb * l
        q_tok = q_all.reshape(N, inner)                      # free view
        kv_tok = kv_all.reshape(N, F, inner)                 # free view (no head transpose copy)
        # torch.chunk(…, 64) is a memory-only split; one tiled kernel is equivalent.
        o = pallas_triplane_attention(q_tok, kv_tok, heads=heads, dim_head=dim_head)
        out2d = pallas_linear(o, params["wo"], params["bo"])  # '(b l) f h c -> b (l f) (h c)', f=1
        return out2d.reshape(tb, l, -1)
    else:
        # standard cross-attention path: fused K/V projection, flash attention over Lk
        Bc, Lc, Cc = context.shape
        ctx2d = context.reshape(Bc * Lc, Cc)
        wkv = jnp.concatenate([params["wk"], params["wv"]], axis=1)   # (Cc, 2*inner)
        kvp = pallas_linear(ctx2d, wkv).reshape(Bc, Lc, 2, inner)
        k = kvp[:, :, 0, :]
        v = kvp[:, :, 1, :]

        def fold(t, bb, ll):   # (b, l, h*c) -> (b*h, l, c)
            return (t.reshape(bb, ll, heads, dim_head)
                     .transpose(0, 2, 1, 3)
                     .reshape(bb * heads, ll, dim_head))

        o = pallas_cross_attention(fold(q, B, L), fold(k, Bc, Lc), fold(v, Bc, Lc))
        o = (o.reshape(B, heads, L, dim_head)
              .transpose(0, 2, 1, 3)
              .reshape(B * L, inner))
        out2d = pallas_linear(o, params["wo"], params["bo"])
        return out2d.reshape(B, L, -1)


# ----------------------------------------------------------------------------
# Pure-JAX reference (numerical check; full f32, HIGHEST precision)
# ----------------------------------------------------------------------------
def reference_forward(params, x, context=None, *, heads, dim_head):
    hp = lax.Precision.HIGHEST
    inner = heads * dim_head
    scale = 1.0 / math.sqrt(dim_head)
    q = jnp.einsum('blc,cd->bld', x, params["wq"], precision=hp)
    if context is None:
        q_all, kv_all = build_triplane_kv(q)
        tb, l, F, _ = kv_all.shape
        qh = q_all.reshape(tb, l, heads, dim_head)
        kvh = kv_all.reshape(tb, l, F, heads, dim_head)
        s = jnp.einsum('blhd,blfhd->blhf', qh, kvh, precision=hp) * scale
        p = jax.nn.softmax(s, axis=-1)
        o = jnp.einsum('blhf,blfhd->blhd', p, kvh, precision=hp).reshape(tb, l, inner)
    else:
        k = jnp.einsum('blc,cd->bld', context, params["wk"], precision=hp)
        v = jnp.einsum('blc,cd->bld', context, params["wv"], precision=hp)
        B, L, _ = x.shape
        Lc = context.shape[1]
        qh = q.reshape(B, L, heads, dim_head)
        kh = k.reshape(B, Lc, heads, dim_head)
        vh = v.reshape(B, Lc, heads, dim_head)
        s = jnp.einsum('bqhd,bkhd->bhqk', qh, kh, precision=hp) * scale
        p = jax.nn.softmax(s, axis=-1)
        o = jnp.einsum('bhqk,bkhd->bqhd', p, vh, precision=hp).reshape(B, L, inner)
    return jnp.einsum('bld,dc->blc', o, params["wo"], precision=hp) + params["bo"]


# ----------------------------------------------------------------------------
if __name__ == "__main__":
    key = jax.random.PRNGKey(0)
    heads, dim_head = 2, 16
    query_dim = 32
    context_dim = 32
    params = init_params(key, query_dim, context_dim, heads, dim_head)

    # --- tri-plane path (context=None): x is (3*b, h*w, query_dim), h = w = 16
    b, hw = 1, 16
    l = hw * hw
    x_tri = jax.random.normal(jax.random.fold_in(key, 1), (3 * b, l, query_dim), jnp.float32)
    out_tri = jax.block_until_ready(
        mem_eff_cross_attention_tri(params, x_tri, None, heads=heads, dim_head=dim_head))
    ref_tri = reference_forward(params, x_tri, None, heads=heads, dim_head=dim_head)
    assert out_tri.shape == (3 * b, l, query_dim)
    err_tri = float(jnp.max(jnp.abs(out_tri - ref_tri)))
    # bf16 MXU operands + approx reciprocal -> relaxed tolerance vs the f32 HIGHEST reference
    assert err_tri < 5e-2, f"tri path mismatch: {err_tri}"

    # --- cross-attention path (context given)
    Bx, Lc = 2, 8
    x_cross = jax.random.normal(jax.random.fold_in(key, 2), (Bx, l, query_dim), jnp.float32)
    ctx = jax.random.normal(jax.random.fold_in(key, 3), (Bx, Lc, context_dim), jnp.float32)
    out_cross = jax.block_until_ready(
        mem_eff_cross_attention_tri(params, x_cross, ctx, heads=heads, dim_head=dim_head))
    ref_cross = reference_forward(params, x_cross, ctx, heads=heads, dim_head=dim_head)
    assert out_cross.shape == (Bx, l, query_dim)
    err_cross = float(jnp.max(jnp.abs(out_cross - ref_cross)))
    assert err_cross < 5e-2, f"cross path mismatch: {err_cross}"

    print("KERNEL_OK")
</pallas_src>

<mosaic_0001>
module attributes {stable_mosaic.version = 11 : i64} {
  func.func @_linear_kernel(%arg0: i32, %arg1: memref<256x32xf32, #tpu.memory_space<vmem>>, %arg2: memref<32x32xf32, #tpu.memory_space<vmem>>, %arg3: memref<256x32xf32, #tpu.memory_space<vmem>>) attributes {dimension_semantics = [#tpu.dimension_semantics<parallel>], iteration_bounds = array<i64: 3>, scalar_prefetch = 0 : i64, scratch_operands = 0 : i64, tpu.core_type = #tpu.core_type<tc>, window_params = [{transform_indices = @transform_0, window_bounds = array<i64: 256, 32>}, {pipeline_mode = #tpu.pipeline_mode<synchronous>, transform_indices = @transform_1, window_bounds = array<i64: 32, 32>}, {transform_indices = @transform_2, window_bounds = array<i64: 256, 32>}]} {
    %c0 = arith.constant 0 : index
    %c0_0 = arith.constant 0 : index
    %0 = vector.load %arg1[%c0, %c0_0] : memref<256x32xf32, #tpu.memory_space<vmem>>, vector<256x32xf32>
    %1 = arith.truncf %0 : vector<256x32xf32> to vector<256x32xbf16>
    %c0_1 = arith.constant 0 : index
    %c0_2 = arith.constant 0 : index
    %2 = vector.load %arg2[%c0_1, %c0_2] : memref<32x32xf32, #tpu.memory_space<vmem>>, vector<32x32xf32>
    %3 = arith.truncf %2 : vector<32x32xf32> to vector<32x32xbf16>
    %cst = arith.constant dense<0.000000e+00> : vector<256x32xf32>
    %4 = tpu.matmul %1, %3, %cst {dimension_numbers = #tpu.dot_dimension_numbers<[1], [0], [0], [1], [0, 0, 1, 1], [], []>} : vector<256x32xbf16>, vector<32x32xbf16>, vector<256x32xf32> -> vector<256x32xf32>
    %c0_3 = arith.constant 0 : index
    %c0_4 = arith.constant 0 : index
    %5 = vector.load %arg3[%c0_3, %c0_4] : memref<256x32xf32, #tpu.memory_space<vmem>>, vector<256x32xf32>
    tpu.vector_store %arg3[%c0_3, %c0_4], %4 {strides = array<i32>} : memref<256x32xf32, #tpu.memory_space<vmem>>, vector<256x32xf32>,
    return
  }
  func.func @transform_0(%arg0: i32) -> (i32, i32) {
    %c0_i32 = arith.constant 0 : i32
    %c0_i32_0 = arith.constant 0 : i32
    return %arg0, %c0_i32 : i32, i32
  }
  func.func @transform_1(%arg0: i32) -> (i32, i32) {
    %c0_i32 = arith.constant 0 : i32
    %c0_i32_0 = arith.constant 0 : i32
    %c0_i32_1 = arith.constant 0 : i32
    return %c0_i32, %c0_i32_0 : i32, i32
  }
  func.func @transform_2(%arg0: i32) -> (i32, i32) {
    %c0_i32 = arith.constant 0 : i32
    %c0_i32_0 = arith.constant 0 : i32
    return %arg0, %c0_i32 : i32, i32
  }
}

</mosaic_0001>

<bundles_post_ra>
// kernel: tpu_custom_call.1
= control target key start
LH: loop header
LB: loop body
LE: loop exit
PB: predicated region body
PF: predicated region fallthrough
CT: control target
= control target key end

     0   :  { %s616_s9 = smov 0   ;;  %s768_s0 = inlined_call_operand.vmem [shape: f32[768,32], index: 0, kind: input, shape index: {}]   ;;  %s769_s1 = inlined_call_operand.vmem [shape: f32[32,32], index: 1, kind: input, shape index: {}]   ;;  %s770_s2 = inlined_call_operand.vmem [shape: f32[768,32], index: 2, kind: output, shape index: {}]  }
   0x1 LB: > { %s500_s10 = sadd.s32 4294967295, %s599_s9   ;;  %p504_p0 = scmp.ge.s32.totalorder %s599_s9, 1  ;;  %s599_s9 = sphi %s616_s9, %s12_s9  }
   0x2   : > { %p113_p1 = scmp.lt.s32.totalorder %s599_s9, 4 }
   0x4   : > { %p114_p2 = pnand %p504_p0, %p113_p1 }
   0x5   : > { %s505_s17 = sshll.u32 (!%p114_p2), %s500_s10, 5 }
   0x6   : > { %117 = sbr.rel (%p114_p2) target bundleno = 246 (0xf6), region = 28  ;;  %p136_p3 = scmp.lt.s32.totalorder (!%p114_p2), %s505_s17, 95 }
   0xb   : > { %v198_v0 = vld [vmem:[%s769_s1 + $0x10] sm:$0xff]  ;;  %v199_v1 = vld [vmem:[%s769_s1 + $0x18] sm:$0xff]  ;;  %v196_v2 = vld [vmem:[%s769_s1] sm:$0xff]  ;;  %s772_s17 = smov (!%p136_p3, %s505_s17), 95  ;;  %vm202_vm0 = vcmask 261120  }
   0xc   : > { %v201_v3 = vpack.c.bf16 %v199_v1, %v198_v0  ;;  %v197_v4 = vld [vmem:[%s769_s1 + $0x8] sm:$0xff]  ;;  %s506_s20 = sshll.u32 %s772_s17, 3 }
   0xd   : > { %v200_v5 = vpack.c.bf16 %v197_v4, %v196_v2  ;;  %s644_s23 = scalar_lea.vmem %s768_s0, %s506_s20  ;;  %s699_s26 = scalar_lea.vmem %s770_s2, %s506_s20 }
   0xe   : > { %545 = vmatprep.subr.bf16.mxu0 %v201_v3  ;;  %581 = vmatprep.subr.bf16.mxu1 %v201_v3  ;;  %v148_v6 = vld [vmem:[%s644_s23] sm:$0xff]  ;;  %v149_v7 = vld [vmem:[%s644_s23 + $0x8] sm:$0xff]  ;;  %v150_v11 = vld [vmem:[%s644_s23 + $0x10] sm:$0xff] }
   0xf   : > { %546 = vmatpush3.bf16.msra.mxu0 %v201_v3  ;;  %583 = vmatpush3.bf16.msra.mxu1 %v201_v3  ;;  %v164_v8 = vld [vmem:[%s644_s23 + $0x80] sm:$0xff]  ;;  %v180_v9 = vpack.c.bf16 %v149_v7, %v148_v6  ;;  %v165_v10 = vld [vmem:[%s644_s23 + $0x88] sm:$0xff]  ;;  %v151_v12 = vld [vmem:[%s644_s23 + $0x18] sm:$0xff] }
  0x10   : > { %547 = vmatprep.subr.bf16.mxu0 %v200_v5  ;;  %582 = vmatprep.subr.bf16.mxu1 %v200_v5  ;;  %v188_v13 = vpack.c.bf16 %v165_v10, %v164_v8  ;;  %v181_v14 = vpack.c.bf16 %v151_v12, %v150_v11  ;;  %v166_v15 = vld [vmem:[%s644_s23 + $0x90] sm:$0xff]  ;;  %v167_v16 = vld [vmem:[%s644_s23 + $0x98] sm:$0xff]  ;;  %v152_v17 = vld [vmem:[%s644_s23 + $0x20] sm:$0xff] }
  0x11   : > { %549 = vmatprep.mubr.msk.bf16.mxu0 %vm202_vm0, %v180_v9  ;;  %v189_v18 = vpack.c.bf16 %v167_v16, %v166_v15  ;;  %v153_v19 = vld [vmem:[%s644_s23 + $0x28] sm:$0xff]  ;;  %v168_v20 = vld [vmem:[%s644_s23 + $0xa0] sm:$0xff]  ;;  %v154_v24 = vld [vmem:[%s644_s23 + $0x30] sm:$0xff] }
  0x12   : > { %v169_v21 = vld [vmem:[%s644_s23 + $0xa8] sm:$0xff]  ;;  %565 = vmatprep.mubr.msk.bf16.mxu1 %vm202_vm0, %v188_v13  ;;  %v182_v22 = vpack.c.bf16 %v153_v19, %v152_v17  ;;  %v155_v25 = vld [vmem:[%s644_s23 + $0x38] sm:$0xff]  ;;  %v170_v26 = vld [vmem:[%s644_s23 + $0xb0] sm:$0xff] }
  0x13   : > { %548 = vmatpush3.bf16.msra.mxu0 %v200_v5  ;;  %584 = vmatpush3.bf16.msra.mxu1 %v200_v5  ;;  %v190_v23 = vpack.c.bf16 %v169_v21, %v168_v20  ;;  %v171_v27 = vld [vmem:[%s644_s23 + $0xb8] sm:$0xff]  ;;  %v156_v28 = vld [vmem:[%s644_s23 + $0x40] sm:$0xff]  ;;  %v157_v29 = vld [vmem:[%s644_s23 + $0x48] sm:$0xff]  ;;  %v183_v32 = vpack.c.bf16 %v155_v25, %v154_v24 }
  0x14   : > { %v172_v30 = vld [vmem:[%s644_s23 + $0xc0] sm:$0xff]  ;;  %v173_v31 = vld [vmem:[%s644_s23 + $0xc8] sm:$0xff]  ;;  %v191_v33 = vpack.c.bf16 %v171_v27, %v170_v26  ;;  %v184_v34 = vpack.c.bf16 %v157_v29, %v156_v28  ;;  %v158_v36 = vld [vmem:[%s644_s23 + $0x50] sm:$0xff] }
  0x15   : > { %v192_v35 = vpack.c.bf16 %v173_v31, %v172_v30  ;;  %v159_v37 = vld [vmem:[%s644_s23 + $0x58] sm:$0xff]  ;;  %v174_v38 = vld [vmem:[%s644_s23 + $0xd0] sm:$0xff]  ;;  %v160_v40 = vld [vmem:[%s644_s23 + $0x60] sm:$0xff] }
  0x16   : > { %550 = vmatmul.mubr.msk.bf16.vlgmr.msra.gmra.mxu0 %vm202_vm0, %v181_v14  ;;  %566 = vmatmul.mubr.msk.bf16.vlgmr.msra.gmra.mxu1 %vm202_vm0, %v189_v18  ;;  %v175_v39 = vld [vmem:[%s644_s23 + $0xd8] sm:$0xff]  ;;  %v161_v41 = vld [vmem:[%s644_s23 + $0x68] sm:$0xff]  ;;  %v176_v42 = vld [vmem:[%s644_s23 + $0xe0] sm:$0xff]  ;;  %v185_v44 = vpack.c.bf16 %v159_v37, %v158_v36 }
  0x17   : > { %553 = vmatprep.mubr.msk.bf16.mxu0 %vm202_vm0, %v182_v22  ;;  %569 = vmatprep.mubr.msk.bf16.mxu1 %vm202_vm0, %v190_v23  ;;  %v177_v43 = vld [vmem:[%s644_s23 + $0xe8] sm:$0xff]  ;;  %v193_v45 = vpack.c.bf16 %v175_v39, %v174_v38  ;;  %v186_v46 = vpack.c.bf16 %v161_v41, %v160_v40  ;;  %v162_v48 = vld [vmem:[%s644_s23 + $0x70] sm:$0xff]  ;;  %v163_v49 = vld [vmem:[%s644_s23 + $0x78] sm:$0xff] }
  0x18   : > { %v194_v47 = vpack.c.bf16 %v177_v43, %v176_v42  ;;  %v178_v50 = vld [vmem:[%s644_s23 + $0xf0] sm:$0xff]  ;;  %v179_v51 = vld [vmem:[%s644_s23 + $0xf8] sm:$0xff]  ;;  %v187_v52 = vpack.c.bf16 %v163_v49, %v162_v48 }
  0x19   : > { %v195_v53 = vpack.c.bf16 %v179_v51, %v178_v50 }
  0x1e   : > { %554 = vmatmul.mubr.msk.bf16.gmra.mxu0 %vm202_vm0, %v183_v32  ;;  %570 = vmatmul.mubr.msk.bf16.gmra.mxu1 %vm202_vm0, %v191_v33 }
  0x1f   : > { %557 = vmatprep.mubr.msk.bf16.mxu0 %vm202_vm0, %v184_v34  ;;  %573 = vmatprep.mubr.msk.bf16.mxu1 %vm202_vm0, %v192_v35 }
  0x26   : > { %558 = vmatmul.mubr.msk.bf16.gmra.mxu0 %vm202_vm0, %v185_v44  ;;  %574 = vmatmul.mubr.msk.bf16.gmra.mxu1 %vm202_vm0, %v193_v45 }
  0x27   : > { %561 = vmatprep.mubr.msk.bf16.mxu0 %vm202_vm0, %v186_v46  ;;  %577 = vmatprep.mubr.msk.bf16.mxu1 %vm202_vm0, %v194_v47 }
  0x2e   : > { %562 = vmatmul.mubr.msk.bf16.gmra.mxu0 %vm202_vm0, %v187_v52  ;;  %578 = vmatmul.mubr.msk.bf16.gmra.mxu1 %vm202_vm0, %v195_v53 }
  0xd6   : > { %v551_v54 = vpop.f32.mrf.mxu0  ;;  %v567_v55 = vpop.f32.mrf.mxu1 }
  0xd7   : > { %414 = vst.msk [vmem:[%s699_s26 + $0x10] sm:$0xff] %vm202_vm0, %v551_v54  ;;  %430 = vst.msk [vmem:[%s699_s26 + $0x90] sm:$0xff] %vm202_vm0, %v567_v55 }
  0xd8   : > { %v285_v56 = vpop.f32.mrf.mxu0  ;;  %v349_v57 = vpop.f32.mrf.mxu1 }
  0xd9   : > { %412 = vst.msk [vmem:[%s699_s26] sm:$0xff] %vm202_vm0, %v285_v56  ;;  %428 = vst.msk [vmem:[%s699_s26 + $0x80] sm:$0xff] %vm202_vm0, %v349_v57 }
  0xda   : > { %v552_v58 = vpop.f32.mrf.mxu0  ;;  %v568_v59 = vpop.f32.mrf.mxu1 }
  0xdb   : > { %415 = vst.msk [vmem:[%s699_s26 + $0x18] sm:$0xff] %vm202_vm0, %v552_v58  ;;  %431 = vst.msk [vmem:[%s699_s26 + $0x98] sm:$0xff] %vm202_vm0, %v568_v59 }
  0xdc   : > { %v288_v60 = vpop.f32.mrf.mxu0  ;;  %v352_v61 = vpop.f32.mrf.mxu1 }
  0xdd   : > { %413 = vst.msk [vmem:[%s699_s26 + $0x8] sm:$0xff] %vm202_vm0, %v288_v60  ;;  %429 = vst.msk [vmem:[%s699_s26 + $0x88] sm:$0xff] %vm202_vm0, %v352_v61 }
  0xde   : > { %v555_v62 = vpop.f32.mrf.mxu0  ;;  %v571_v63 = vpop.f32.mrf.mxu1 }
  0xdf   : > { %418 = vst.msk [vmem:[%s699_s26 + $0x30] sm:$0xff] %vm202_vm0, %v555_v62  ;;  %434 = vst.msk [vmem:[%s699_s26 + $0xb0] sm:$0xff] %vm202_vm0, %v571_v63 }
  0xe0   : > { %v301_v0 = vpop.f32.mrf.mxu0  ;;  %v365_v1 = vpop.f32.mrf.mxu1 }
  0xe1   : > { %416 = vst.msk [vmem:[%s699_s26 + $0x20] sm:$0xff] %vm202_vm0, %v301_v0  ;;  %432 = vst.msk [vmem:[%s699_s26 + $0xa0] sm:$0xff] %vm202_vm0, %v365_v1 }
  0xe2   : > { %v556_v2 = vpop.f32.mrf.mxu0  ;;  %v572_v3 = vpop.f32.mrf.mxu1 }
  0xe3   : > { %419 = vst.msk [vmem:[%s699_s26 + $0x38] sm:$0xff] %vm202_vm0, %v556_v2  ;;  %435 = vst.msk [vmem:[%s699_s26 + $0xb8] sm:$0xff] %vm202_vm0, %v572_v3 }
  0xe4   : > { %v304_v4 = vpop.f32.mrf.mxu0  ;;  %v368_v5 = vpop.f32.mrf.mxu1 }
  0xe5   : > { %417 = vst.msk [vmem:[%s699_s26 + $0x28] sm:$0xff] %vm202_vm0, %v304_v4  ;;  %433 = vst.msk [vmem:[%s699_s26 + $0xa8] sm:$0xff] %vm202_vm0, %v368_v5 }
  0xe6   : > { %v559_v6 = vpop.f32.mrf.mxu0  ;;  %v575_v7 = vpop.f32.mrf.mxu1 }
  0xe7   : > { %422 = vst.msk [vmem:[%s699_s26 + $0x50] sm:$0xff] %vm202_vm0, %v559_v6  ;;  %438 = vst.msk [vmem:[%s699_s26 + $0xd0] sm:$0xff] %vm202_vm0, %v575_v7 }
  0xe8   : > { %v317_v8 = vpop.f32.mrf.mxu0  ;;  %v381_v9 = vpop.f32.mrf.mxu1 }
  0xe9   : > { %420 = vst.msk [vmem:[%s699_s26 + $0x40] sm:$0xff] %vm202_vm0, %v317_v8  ;;  %436 = vst.msk [vmem:[%s699_s26 + $0xc0] sm:$0xff] %vm202_vm0, %v381_v9 }
  0xea   : > { %v560_v10 = vpop.f32.mrf.mxu0  ;;  %v576_v11 = vpop.f32.mrf.mxu1 }
  0xeb   : > { %423 = vst.msk [vmem:[%s699_s26 + $0x58] sm:$0xff] %vm202_vm0, %v560_v10  ;;  %439 = vst.msk [vmem:[%s699_s26 + $0xd8] sm:$0xff] %vm202_vm0, %v576_v11 }
  0xec   : > { %v320_v12 = vpop.f32.mrf.mxu0  ;;  %v384_v13 = vpop.f32.mrf.mxu1 }
  0xed   : > { %421 = vst.msk [vmem:[%s699_s26 + $0x48] sm:$0xff] %vm202_vm0, %v320_v12  ;;  %437 = vst.msk [vmem:[%s699_s26 + $0xc8] sm:$0xff] %vm202_vm0, %v384_v13 }
  0xee   : > { %v563_v14 = vpop.f32.mrf.mxu0  ;;  %v579_v15 = vpop.f32.mrf.mxu1 }
  0xef   : > { %426 = vst.msk [vmem:[%s699_s26 + $0x70] sm:$0xff] %vm202_vm0, %v563_v14  ;;  %442 = vst.msk [vmem:[%s699_s26 + $0xf0] sm:$0xff] %vm202_vm0, %v579_v15 }
  0xf0   : > { %v333_v16 = vpop.f32.mrf.mxu0  ;;  %v397_v17 = vpop.f32.mrf.mxu1 }
  0xf1   : > { %424 = vst.msk [vmem:[%s699_s26 + $0x60] sm:$0xff] %vm202_vm0, %v333_v16  ;;  %440 = vst.msk [vmem:[%s699_s26 + $0xe0] sm:$0xff] %vm202_vm0, %v397_v17 }
  0xf2   : > { %v564_v18 = vpop.f32.mrf.mxu0  ;;  %v580_v19 = vpop.f32.mrf.mxu1 }
  0xf3   : > { %427 = vst.msk [vmem:[%s699_s26 + $0x78] sm:$0xff] %vm202_vm0, %v564_v18  ;;  %443 = vst.msk [vmem:[%s699_s26 + $0xf8] sm:$0xff] %vm202_vm0, %v580_v19 }
  0xf4   : > { %v336_v20 = vpop.f32.mrf.mxu0  ;;  %v400_v21 = vpop.f32.mrf.mxu1 }
  0xf5   : > { %425 = vst.msk [vmem:[%s699_s26 + $0x68] sm:$0xff] %vm202_vm0, %v336_v20  ;;  %441 = vst.msk [vmem:[%s699_s26 + $0xe8] sm:$0xff] %vm202_vm0, %v400_v21 }
  0xf6 PF: > { %s12_s9 = sadd.s32 1, %s599_s9  }
  0xf7   : > { %p9_p4 = scmp.ge.s32.totalorder %s12_s9, 5  }
  0xf9   :  { %11 = sbr.rel (!%p9_p4) target bundleno = 1 (0x1), region = 58 }

</bundles_post_ra>
